<compile_context>
chip_gen: v5e
topology: v5e:2x2
jax: 0.10.0
libtpu: 0.0.40
codegen_flags: <defaults>
</compile_context>

<pallas_src>
from functools import partial

import jax
import jax.numpy as jnp
from jax.experimental import pallas as pl
from jax.experimental.pallas import tpu as pltpu


# ----------------------------------------------------------------------------
# Pallas kernel: per-sample sum of squared errors for one batch block
# ----------------------------------------------------------------------------
def _designer_loss_kernel(x_ref, temb_ref, tmask_ref, noise_ref,
                          w_in_ref, w_cond_ref, w_out_ref, sse_ref):
    # x_ref, noise_ref : (Bb*L, C)  flattened sequence block (bf16)   VMEM
    # temb_ref         : (Bb, T, D) text embeddings          (bf16)   VMEM
    # tmask_ref        : (Bb, T, 1) text mask 0/1            (bf16)   VMEM
    # w_in_ref (C,H), w_cond_ref (D,H), w_out_ref (H,C)      (bf16)   VMEM, grid-resident
    # sse_ref          : (Bb, 1)    per-sample SSE           (f32)    VMEM
    Bb = temb_ref.shape[0]
    BbL, C = x_ref.shape
    L = BbL // Bb
    H = w_in_ref.shape[1]
    w_dt = w_in_ref.dtype

    # --- masked mean-pool of text embeddings (f32 elementwise, v5e-safe) ---
    temb = temb_ref[...].astype(jnp.float32)                 # (Bb, T, D)
    mask = tmask_ref[...].astype(jnp.float32)                # (Bb, T, 1)
    denom = jnp.sum(mask, axis=1) + jnp.float32(1e-8)        # (Bb, 1)
    pooled = jnp.sum(temb * mask, axis=1) / denom            # (Bb, D)

    # --- conditioned denoiser: x @ W_in + cond -> relu -> @ W_out ---
    cond = jnp.dot(pooled.astype(w_dt), w_cond_ref[...],
                   preferred_element_type=jnp.float32)       # (Bb, H)
    h = jnp.dot(x_ref[...], w_in_ref[...],
                preferred_element_type=jnp.float32)          # (Bb*L, H)
    h = h.reshape(Bb, L, H) + cond.reshape(Bb, 1, H)
    h = jnp.maximum(h, 0.0)
    pred = jnp.dot(h.reshape(BbL, H).astype(w_dt), w_out_ref[...],
                   preferred_element_type=jnp.float32)       # (Bb*L, C)

    # --- vectorized squared error, single reduction at the end ---
    diff = pred - noise_ref[...].astype(jnp.float32)         # (Bb*L, C) f32
    sq = (diff * diff).reshape(Bb, L, C)
    sse_ref[...] = jnp.sum(jnp.sum(sq, axis=2), axis=1, keepdims=True)


@partial(jax.jit, static_argnames=("block_b",))
def _sse_per_sample(x2, temb, tmask, noise2, w_in, w_cond, w_out, *, block_b):
    """Single gridded launch over the padded batch -> (Bp, 1) per-sample SSE."""
    Bp, T, D = temb.shape
    BpL, C = x2.shape
    L = BpL // Bp
    H = w_in.shape[1]
    nb = Bp // block_b
    bl = block_b * L

    # NOTE(v7x): block_b should be sized so 2x(double buffer) of
    # (x + noise + temb + tmask) blocks stays well under the scoped VMEM limit
    # (64 MiB physical on v7x). At these shapes the blocks are tiny.
    return pl.pallas_call(
        _designer_loss_kernel,
        out_shape=jax.ShapeDtypeStruct((Bp, 1), jnp.float32),
        grid_spec=pltpu.PrefetchScalarGridSpec(
            num_scalar_prefetch=0,
            grid=(nb,),
            in_specs=[
                pl.BlockSpec((bl, C), lambda i: (i, 0)),            # x
                pl.BlockSpec((block_b, T, D), lambda i: (i, 0, 0)),  # text embeds
                pl.BlockSpec((block_b, T, 1), lambda i: (i, 0, 0)),  # text mask
                pl.BlockSpec((bl, C), lambda i: (i, 0)),            # noise
                # weights: same block every step -> VMEM-resident, no re-DMA
                pl.BlockSpec((C, H), lambda i: (0, 0)),
                pl.BlockSpec((D, H), lambda i: (0, 0)),
                pl.BlockSpec((H, C), lambda i: (0, 0)),
            ],
            out_specs=pl.BlockSpec((block_b, 1), lambda i: (i, 0)),
        ),
        compiler_params=pltpu.CompilerParams(
            dimension_semantics=("parallel",),   # independent per-block partials
        ),
    )(x2, temb, tmask, noise2, w_in, w_cond, w_out)


# ----------------------------------------------------------------------------
# Trainer wrapper (mirrors ProteinDesigner_Trainer.forward chunking semantics)
# ----------------------------------------------------------------------------
def _num_to_groups(num, divisor):
    groups = num // divisor
    remainder = num % divisor
    arr = [divisor] * groups
    if remainder > 0:
        arr.append(remainder)
    return arr


class ProteinDesignerTrainerPallas:
    def __init__(self, channels=4, text_dim=32, hidden=32, num_unets=1,
                 seed=0, block_b=8, compute_dtype=jnp.bfloat16):
        self.num_unets = num_unets
        self.only_train_unet_number = None
        self.block_b = block_b
        self.compute_dtype = compute_dtype
        key = jax.random.PRNGKey(seed)
        k1, k2, k3, k4 = jax.random.split(key, 4)
        # deterministic synthetic "unet" parameters (bf16 MXU inputs)
        self.w_in = (jax.random.normal(k1, (channels, hidden), jnp.float32)
                     * (1.0 / channels ** 0.5)).astype(compute_dtype)
        self.w_cond = (jax.random.normal(k2, (text_dim, hidden), jnp.float32)
                       * (1.0 / text_dim ** 0.5)).astype(compute_dtype)
        self.w_out = (jax.random.normal(k3, (hidden, channels), jnp.float32)
                      * (1.0 / hidden ** 0.5)).astype(compute_dtype)
        self._noise_key = k4  # advanced every call -> fresh noise per step

    def validate_unet_number(self, unet_number=None):
        if self.num_unets == 1:
            unet_number = 1 if unet_number is None else unet_number
        assert 0 < unet_number <= self.num_unets
        return unet_number

    def forward(self, images, text_embeds, text_masks,
                unet_number=None, max_batch_size=None, noise_key=None):
        """images: (B, C, L) NCL like PyTorch; text_embeds: (B, T, D);
        text_masks: (B, T) (0/1). Returns total_loss as a python float."""
        unet_number = self.validate_unet_number(unet_number)
        self.only_train_unet_number = unet_number

        B, C, L = images.shape
        split_size = B if max_batch_size is None else max_batch_size
        chunk_sizes = _num_to_groups(B, split_size)

        cdt = self.compute_dtype
        # NCL -> channel-last (B, L, C); bf16 halves HBM->VMEM DMA bytes.
        x = jnp.transpose(images, (0, 2, 1)).astype(cdt)
        temb = text_embeds.astype(cdt)
        tmask = text_masks.astype(cdt)[..., None]            # (B, T, 1)

        if noise_key is None:
            self._noise_key, noise_key = jax.random.split(self._noise_key)
        noise = jax.random.normal(noise_key, x.shape, jnp.float32).astype(cdt)

        # Pad batch to a multiple of block_b: one compiled shape, one launch,
        # no remainder-chunk retrace. Padded rows (zero x/mask/noise) give
        # exactly zero SSE and are sliced away below.
        block_b = self.block_b
        Bp = ((B + block_b - 1) // block_b) * block_b
        pad = Bp - B
        if pad:
            x = jnp.pad(x, ((0, pad), (0, 0), (0, 0)))
            temb = jnp.pad(temb, ((0, pad), (0, 0), (0, 0)))
            tmask = jnp.pad(tmask, ((0, pad), (0, 0), (0, 0)))
            noise = jnp.pad(noise, ((0, pad), (0, 0), (0, 0)))

        x2 = x.reshape(Bp * L, C)          # flatten so the kernel does one big matmul
        noise2 = noise.reshape(Bp * L, C)

        sse = _sse_per_sample(x2, temb, tmask, noise2,
                              self.w_in, self.w_cond, self.w_out,
                              block_b=block_b)[:B, 0]        # (B,) per-sample SSE

        # chunk_size_frac weighting exactly mirroring the torch forward,
        # accumulated device-side; single host sync at the end (.item()).
        n_per_sample = L * C
        total = jnp.float32(0.0)
        start = 0
        for cs in chunk_sizes:
            chunk_loss = jnp.sum(sse[start:start + cs]) / jnp.float32(cs * n_per_sample)
            total = total + chunk_loss * jnp.float32(cs / B)
            start += cs
        return float(jax.block_until_ready(total))

    __call__ = forward


# ----------------------------------------------------------------------------
if __name__ == "__main__":
    B, C, L = 2, 4, 16     # batch, channels, sequence length (NCL input)
    T, D, H = 8, 32, 32    # text tokens, text embed dim, hidden dim

    key = jax.random.PRNGKey(0)
    k_img, k_emb, k_msk = jax.random.split(key, 3)
    images = jax.random.normal(k_img, (B, C, L), jnp.float32)
    text_embeds = jax.random.normal(k_emb, (B, T, D), jnp.float32)
    text_masks = (jax.random.uniform(k_msk, (B, T)) > 0.3).astype(jnp.float32)

    trainer = ProteinDesignerTrainerPallas(channels=C, text_dim=D, hidden=H)

    # max_batch_size=1 exercises the chunked-weighting path (2 chunks, 1 launch)
    total_loss = trainer(images, text_embeds, text_masks,
                         unet_number=1, max_batch_size=1,
                         noise_key=jax.random.PRNGKey(123))
    assert isinstance(total_loss, float) and total_loss == total_loss  # not NaN

    # un-chunked path (same single-launch kernel, single chunk weighting)
    total_loss_full = trainer(images, text_embeds, text_masks,
                              noise_key=jax.random.PRNGKey(123))
    assert isinstance(total_loss_full, float)
    # chunk-weighted sum of means == global mean -> paths agree numerically
    assert abs(total_loss - total_loss_full) < 1e-3 * (abs(total_loss_full) + 1.0)

    print("KERNEL_OK")
</pallas_src>

<mosaic_0001>
module attributes {stable_mosaic.version = 11 : i64} {
  func.func @_designer_loss_kernel(%arg0: i32, %arg1: memref<128x4xbf16, #tpu.memory_space<vmem>>, %arg2: memref<8x8x32xbf16, #tpu.memory_space<vmem>>, %arg3: memref<8x8x1xbf16, #tpu.memory_space<vmem>>, %arg4: memref<128x4xbf16, #tpu.memory_space<vmem>>, %arg5: memref<4x32xbf16, #tpu.memory_space<vmem>>, %arg6: memref<32x32xbf16, #tpu.memory_space<vmem>>, %arg7: memref<32x4xbf16, #tpu.memory_space<vmem>>, %arg8: memref<8x1xf32, #tpu.memory_space<vmem>>) attributes {dimension_semantics = [#tpu.dimension_semantics<parallel>], iteration_bounds = array<i64: 1>, scalar_prefetch = 0 : i64, scratch_operands = 0 : i64, tpu.core_type = #tpu.core_type<tc>, window_params = [{transform_indices = @transform_0, window_bounds = array<i64: 128, 4>}, {transform_indices = @transform_1, window_bounds = array<i64: 8, 8, 32>}, {transform_indices = @transform_2, window_bounds = array<i64: 8, 8, 1>}, {transform_indices = @transform_3, window_bounds = array<i64: 128, 4>}, {pipeline_mode = #tpu.pipeline_mode<synchronous>, transform_indices = @transform_4, window_bounds = array<i64: 4, 32>}, {pipeline_mode = #tpu.pipeline_mode<synchronous>, transform_indices = @transform_5, window_bounds = array<i64: 32, 32>}, {pipeline_mode = #tpu.pipeline_mode<synchronous>, transform_indices = @transform_6, window_bounds = array<i64: 32, 4>}, {transform_indices = @transform_7, window_bounds = array<i64: 8, 1>}]} {
    %c0 = arith.constant 0 : index
    %c0_0 = arith.constant 0 : index
    %c0_1 = arith.constant 0 : index
    %0 = vector.load %arg2[%c0, %c0_0, %c0_1] : memref<8x8x32xbf16, #tpu.memory_space<vmem>>, vector<8x8x32xbf16>
    %1 = arith.extf %0 : vector<8x8x32xbf16> to vector<8x8x32xf32>
    %c0_2 = arith.constant 0 : index
    %c0_3 = arith.constant 0 : index
    %c0_4 = arith.constant 0 : index
    %2 = vector.load %arg3[%c0_2, %c0_3, %c0_4] : memref<8x8x1xbf16, #tpu.memory_space<vmem>>, vector<8x8x1xbf16>
    %3 = arith.extf %2 : vector<8x8x1xbf16> to vector<8x8x1xf32>
    %cst = arith.constant dense<0.000000e+00> : vector<8x1xf32>
    %4 = vector.multi_reduction <add>, %3, %cst [1] : vector<8x8x1xf32> to vector<8x1xf32>
    %cst_5 = arith.constant 9.99999993E-9 : f32
    %5 = vector.broadcast %cst_5 : f32 to vector<8x1xf32>
    %6 = arith.addf %4, %5 : vector<8x1xf32>
    %7 = vector.broadcast %3 : vector<8x8x1xf32> to vector<8x8x32xf32>
    %8 = arith.mulf %1, %7 : vector<8x8x32xf32>
    %cst_6 = arith.constant dense<0.000000e+00> : vector<8x32xf32>
    %9 = vector.multi_reduction <add>, %8, %cst_6 [1] : vector<8x8x32xf32> to vector<8x32xf32>
    %10 = vector.broadcast %6 : vector<8x1xf32> to vector<8x32xf32>
    %11 = arith.divf %9, %10 : vector<8x32xf32>
    %12 = arith.truncf %11 : vector<8x32xf32> to vector<8x32xbf16>
    %c0_7 = arith.constant 0 : index
    %c0_8 = arith.constant 0 : index
    %13 = vector.load %arg6[%c0_7, %c0_8] : memref<32x32xbf16, #tpu.memory_space<vmem>>, vector<32x32xbf16>
    %cst_9 = arith.constant dense<0.000000e+00> : vector<8x32xf32>
    %14 = tpu.matmul %12, %13, %cst_9 {dimension_numbers = #tpu.dot_dimension_numbers<[1], [0], [0], [1], [0, 0, 1, 1], [], []>} : vector<8x32xbf16>, vector<32x32xbf16>, vector<8x32xf32> -> vector<8x32xf32>
    %c0_10 = arith.constant 0 : index
    %c0_11 = arith.constant 0 : index
    %15 = vector.load %arg1[%c0_10, %c0_11] : memref<128x4xbf16, #tpu.memory_space<vmem>>, vector<128x4xbf16>
    %c0_12 = arith.constant 0 : index
    %c0_13 = arith.constant 0 : index
    %16 = vector.load %arg5[%c0_12, %c0_13] : memref<4x32xbf16, #tpu.memory_space<vmem>>, vector<4x32xbf16>
    %cst_14 = arith.constant dense<0.000000e+00> : vector<128x32xf32>
    %17 = tpu.matmul %15, %16, %cst_14 {dimension_numbers = #tpu.dot_dimension_numbers<[1], [0], [0], [1], [0, 0, 1, 1], [], []>} : vector<128x4xbf16>, vector<4x32xbf16>, vector<128x32xf32> -> vector<128x32xf32>
    %18 = vector.shape_cast %17 : vector<128x32xf32> to vector<8x16x32xf32>
    %19 = vector.shape_cast %14 : vector<8x32xf32> to vector<8x1x32xf32>
    %20 = vector.broadcast %19 : vector<8x1x32xf32> to vector<8x16x32xf32>
    %21 = arith.addf %18, %20 : vector<8x16x32xf32>
    %cst_15 = arith.constant 0.000000e+00 : f32
    %22 = vector.broadcast %cst_15 : f32 to vector<8x16x32xf32>
    %23 = arith.maximumf %21, %22 : vector<8x16x32xf32>
    %24 = vector.shape_cast %23 : vector<8x16x32xf32> to vector<128x32xf32>
    %25 = arith.truncf %24 : vector<128x32xf32> to vector<128x32xbf16>
    %c0_16 = arith.constant 0 : index
    %c0_17 = arith.constant 0 : index
    %26 = vector.load %arg7[%c0_16, %c0_17] : memref<32x4xbf16, #tpu.memory_space<vmem>>, vector<32x4xbf16>
    %cst_18 = arith.constant dense<0.000000e+00> : vector<128x4xf32>
    %27 = tpu.matmul %25, %26, %cst_18 {dimension_numbers = #tpu.dot_dimension_numbers<[1], [0], [0], [1], [0, 0, 1, 1], [], []>} : vector<128x32xbf16>, vector<32x4xbf16>, vector<128x4xf32> -> vector<128x4xf32>
    %c0_19 = arith.constant 0 : index
    %c0_20 = arith.constant 0 : index
    %28 = vector.load %arg4[%c0_19, %c0_20] : memref<128x4xbf16, #tpu.memory_space<vmem>>, vector<128x4xbf16>
    %29 = arith.extf %28 : vector<128x4xbf16> to vector<128x4xf32>
    %30 = arith.subf %27, %29 : vector<128x4xf32>
    %31 = arith.mulf %30, %30 : vector<128x4xf32>
    %32 = vector.shape_cast %31 : vector<128x4xf32> to vector<8x16x4xf32>
    %cst_21 = arith.constant dense<0.000000e+00> : vector<8x16xf32>
    %33 = vector.multi_reduction <add>, %32, %cst_21 [2] : vector<8x16x4xf32> to vector<8x16xf32>
    %cst_22 = arith.constant dense<0.000000e+00> : vector<8xf32>
    %34 = vector.multi_reduction <add>, %33, %cst_22 [1] : vector<8x16xf32> to vector<8xf32>
    %35 = vector.shape_cast %34 : vector<8xf32> to vector<8x1xf32>
    %c0_23 = arith.constant 0 : index
    %c0_24 = arith.constant 0 : index
    %36 = vector.load %arg8[%c0_23, %c0_24] : memref<8x1xf32, #tpu.memory_space<vmem>>, vector<8x1xf32>
    tpu.vector_store %arg8[%c0_23, %c0_24], %35 {strides = array<i32>} : memref<8x1xf32, #tpu.memory_space<vmem>>, vector<8x1xf32>,
    return
  }
  func.func @transform_0(%arg0: i32) -> (i32, i32) {
    %c0_i32 = arith.constant 0 : i32
    %c0_i32_0 = arith.constant 0 : i32
    return %arg0, %c0_i32 : i32, i32
  }
  func.func @transform_1(%arg0: i32) -> (i32, i32, i32) {
    %c0_i32 = arith.constant 0 : i32
    %c0_i32_0 = arith.constant 0 : i32
    %c0_i32_1 = arith.constant 0 : i32
    return %arg0, %c0_i32, %c0_i32_0 : i32, i32, i32
  }
  func.func @transform_2(%arg0: i32) -> (i32, i32, i32) {
    %c0_i32 = arith.constant 0 : i32
    %c0_i32_0 = arith.constant 0 : i32
    %c0_i32_1 = arith.constant 0 : i32
    return %arg0, %c0_i32, %c0_i32_0 : i32, i32, i32
  }
  func.func @transform_3(%arg0: i32) -> (i32, i32) {
    %c0_i32 = arith.constant 0 : i32
    %c0_i32_0 = arith.constant 0 : i32
    return %arg0, %c0_i32 : i32, i32
  }
  func.func @transform_4(%arg0: i32) -> (i32, i32) {
    %c0_i32 = arith.constant 0 : i32
    %c0_i32_0 = arith.constant 0 : i32
    %c0_i32_1 = arith.constant 0 : i32
    return %c0_i32, %c0_i32_0 : i32, i32
  }
  func.func @transform_5(%arg0: i32) -> (i32, i32) {
    %c0_i32 = arith.constant 0 : i32
    %c0_i32_0 = arith.constant 0 : i32
    %c0_i32_1 = arith.constant 0 : i32
    return %c0_i32, %c0_i32_0 : i32, i32
  }
  func.func @transform_6(%arg0: i32) -> (i32, i32) {
    %c0_i32 = arith.constant 0 : i32
    %c0_i32_0 = arith.constant 0 : i32
    %c0_i32_1 = arith.constant 0 : i32
    return %c0_i32, %c0_i32_0 : i32, i32
  }
  func.func @transform_7(%arg0: i32) -> (i32, i32) {
    %c0_i32 = arith.constant 0 : i32
    %c0_i32_0 = arith.constant 0 : i32
    return %arg0, %c0_i32 : i32, i32
  }
}

</mosaic_0001>

<bundles_post_ra>
// kernel: _sse_per_sample.1
= control target key start
LH: loop header
LB: loop body
LE: loop exit
PB: predicated region body
PF: predicated region fallthrough
CT: control target
= control target key end

     0   :  { %v1118_v0 = vmov 0   ;;  %vm59_vm0 = vcmask 7168   ;;  %vm542_vm1 = vcmask 1041408   ;;  %vm517_vm2 = vcmask 31744   ;;  %s1514_s2 = inlined_call_operand.vmem [shape: bf16[8,8,1], index: 2, kind: input, shape index: {}]   ;;  %s1515_s4 = inlined_call_operand.vmem [shape: bf16[4,32], index: 4, kind: input, shape index: {}]   ;;  %s1516_s0 = inlined_call_operand.vmem [shape: bf16[128,4], index: 0, kind: input, shape index: {}]   ;;  %s1517_s1 = inlined_call_operand.vmem [shape: bf16[8,8,32], index: 1, kind: input, shape index: {}]   ;;  %s1518_s5 = inlined_call_operand.vmem [shape: bf16[32,32], index: 5, kind: input, shape index: {}]   ;;  %s1519_s6 = inlined_call_operand.vmem [shape: bf16[32,4], index: 6, kind: input, shape index: {}]   ;;  %s1520_s3 = inlined_call_operand.vmem [shape: bf16[128,4], index: 3, kind: input, shape index: {}]   ;;  %s1521_s7 = inlined_call_operand.vmem [shape: f32[8,1], index: 7, kind: output, shape index: {}]  }
   0x1   :  { %1079 = vset.pattern.permute.xlu1 %v1118_v0  ;;  %v1015_v1 = vld [vmem:[%s1514_s2] sm:$0xff]   ;;  %1085 = vset.pattern.permute.xlu2 %v1118_v0  ;;  %v1065_v2 = vld [vmem:[%s1514_s2 + $0x8] sm:$0xff]   ;;  %v1066_v3 = vld [vmem:[%s1514_s2 + $0x10] sm:$0xff]   ;;  %vm172_vm3 = vcmask 261120  }
   0x2   :  { %v1016_v4 = vunpack.c.l.bf16 %v1015_v1  ;;  %v1017_v5 = vunpack.c.h.bf16 %v1015_v1  ;;  %v1020_v6 = vunpack.c.l.bf16 %v1065_v2  ;;  %v1021_v7 = vunpack.c.h.bf16 %v1065_v2  ;;  %1096 = vset.pattern.permute.xlu0 %v1118_v0  ;;  %v1171_v8 = vld [vmem:[%s1514_s2 + $0x18] sm:$0xff]  }
   0x3   :  { %v1024_v9 = vunpack.c.l.bf16 %v1066_v3  ;;  %v1025_v10 = vunpack.c.h.bf16 %v1066_v3  ;;  %v1029_v11 = vunpack.c.h.bf16 %v1171_v8  ;;  %v1028_v23 = vunpack.c.l.bf16 %v1171_v8  ;;  %v991_v8 = vld [vmem:[%s1516_s0 + $0x18] sm:$0xff] }
   0x4   :  { %v67_v12 = vsel %vm59_vm0, %v1017_v5, 0.0  ;;  %v1080_v13 = vpack.i.bf16 %v1017_v5, %v1016_v4  ;;  %v60_v14 = vsel %vm59_vm0, %v1016_v4, 0.0  ;;  %v81_v15 = vsel %vm59_vm0, %v1021_v7, 0.0 }
   0x5   :  { %v68_v16 = vrot.slane %v67_v12, 4  ;;  %v61_v17 = vrot.slane %v60_v14, 4  ;;  %v82_v18 = vrot.slane %v81_v15, 4  ;;  %v1086_v19 = vpack.i.bf16 %v1021_v7, %v1020_v6 }
   0x6   :  { %1081 = vperm.xlu1 %1079, %v1080_v13   ;;  %v74_v20 = vsel %vm59_vm0, %v1020_v6, 0.0  ;;  %v95_v21 = vsel %vm59_vm0, %v1025_v10, 0.0  ;;  %v88_v22 = vsel %vm59_vm0, %v1024_v9, 0.0  ;;  %v1091_v29 = vpack.i.bf16 %v1025_v10, %v1024_v9 }
   0x7   :  { %v69_v24 = vadd.f32 %v68_v16, %v67_v12  ;;  %v83_v25 = vadd.f32 %v82_v18, %v81_v15  ;;  %1087 = vperm.xlu2 %1085, %v1086_v19   ;;  %v75_v26 = vrot.slane %v74_v20, 4  ;;  %v62_v27 = vadd.f32 %v61_v17, %v60_v14  ;;  %v476_v19 = vld [vmem:[%s1515_s4] sm:$0x3] }
   0x8   :  { %v96_v28 = vrot.slane %v95_v21, 4  ;;  %v89_v30 = vrot.slane %v88_v22, 4  ;;  %v109_v31 = vsel %vm59_vm0, %v1029_v11, 0.0  ;;  %v102_v39 = vsel %vm59_vm0, %v1028_v23, 0.0 }
   0x9   :  { %v76_v32 = vadd.f32 %v75_v26, %v74_v20  ;;  %v63_v33 = vrot.slane %v62_v27, 2  ;;  %v70_v34 = vrot.slane %v69_v24, 2  ;;  %v84_v35 = vrot.slane %v83_v25, 2 }
   0xa   :  { %v97_v36 = vadd.f32 %v96_v28, %v95_v21  ;;  %v110_v37 = vrot.slane %v109_v31, 4  ;;  %v90_v38 = vadd.f32 %v89_v30, %v88_v22  ;;  %v103_v51 = vrot.slane %v102_v39, 4  ;;  %v992_v21 = vld [vmem:[%s1516_s0 + $0x20] sm:$0xff]  ;;  %v1062_v22 = vld [vmem:[%s1517_s1 + $0x8] sm:$0xff]  }
   0xb   :  { %v77_v40 = vrot.slane %v76_v32, 2  ;;  %v64_v41 = vadd.f32 %v63_v33, %v62_v27  ;;  %v71_v42 = vadd.f32 %v70_v34, %v69_v24  ;;  %v85_v43 = vadd.f32 %v84_v35, %v83_v25  ;;  %v1063_v27 = vld [vmem:[%s1517_s1 + $0x10] sm:$0xff]  }
   0xc   :  { %v98_v44 = vrot.slane %v97_v36, 2  ;;  %v111_v48 = vadd.f32 %v110_v37, %v109_v31  ;;  %v91_v50 = vrot.slane %v90_v38, 2  ;;  %v104_v0 = vadd.f32 %v103_v51, %v102_v39  ;;  %v999_v37 = vld [vmem:[%s1517_s1] sm:$0xff]  }
   0xd   :  { %v78_v45 = vadd.f32 %v77_v40, %v76_v32  ;;  %v65_v46 = vrot.slane %v64_v41, 1  ;;  %v86_v47 = vrot.slane %v85_v43, 1  ;;  %v72_v54 = vrot.slane %v71_v42, 1 }
   0xe   :  { %v99_v49 = vadd.f32 %v98_v44, %v97_v36  ;;  %v112_v59 = vrot.slane %v111_v48, 2  ;;  %v92_v60 = vadd.f32 %v91_v50, %v90_v38  ;;  %v105_v5 = vrot.slane %v104_v0, 2  ;;  %v1064_v38 = vld [vmem:[%s1517_s1 + $0x18] sm:$0xff]  }
   0xf   :  { %v79_v52 = vrot.slane %v78_v45, 1  ;;  %v66_v53 = vadd.f32 %v65_v46, %v64_v41  ;;  %1092 = vperm.xlu2 %1085, %v1091_v29   ;;  %v87_v55 = vadd.f32 %v86_v47, %v85_v43  ;;  %v73_v62 = vadd.f32 %v72_v54, %v71_v42  ;;  %v993_v41 = vld [vmem:[%s1516_s0 + $0x28] sm:$0xff] }
  0x10   :  { %v100_v58 = vrot.slane %v99_v49, 1  ;;  %v113_v2 = vadd.f32 %v112_v59, %v111_v48  ;;  %v93_v4 = vrot.slane %v92_v60, 1  ;;  %v1097_v10 = vpack.i.bf16 %v1029_v11, %v1028_v23 }
  0x11   :  { %v80_v56 = vadd.f32 %v79_v52, %v78_v45  ;;  %v116_v57 = vadd.f32 1e-08, %v66_v53  ;;  %v119_v63 = vadd.f32 1e-08, %v87_v55  ;;  %v117_v3 = vadd.f32 1e-08, %v73_v62 }
  0x12   :  { %v101_v1 = vadd.f32 %v100_v58, %v99_v49  ;;  %v114_v7 = vrot.slane %v113_v2, 1  ;;  %v94_v9 = vadd.f32 %v93_v4, %v92_v60  ;;  %v106_v12 = vadd.f32 %v105_v5, %v104_v0 }
  0x13   :  { %v118_v61 = vadd.f32 1e-08, %v80_v56  ;;  %231 = vperm.xlu0 %1096, %v116_v57   ;;  %v1190_v20 = vsel %vm542_vm1, %v476_v19, 0  ;;  %v1005_v25 = vunpack.c.h.bf16 %v1062_v22  ;;  %v1004_v29 = vunpack.c.l.bf16 %v1062_v22 }
  0x14   :  { %v121_v6 = vadd.f32 1e-08, %v101_v1  ;;  %v115_v13 = vadd.f32 %v114_v7, %v113_v2  ;;  %v120_v14 = vadd.f32 1e-08, %v94_v9  ;;  %v107_v15 = vrot.slane %v106_v12, 1  ;;  %1075 = vmatpush.bf16.msra.mxu1 %v1190_v20 }
  0x15   :  { %241 = vperm.xlu1 %1079, %v118_v61   ;;  %v1008_v32 = vunpack.c.l.bf16 %v1063_v27  ;;  %v1009_v35 = vunpack.c.h.bf16 %v1063_v27  ;;  %v1000_v44 = vunpack.c.l.bf16 %v999_v37  ;;  %v1001_v45 = vunpack.c.h.bf16 %v999_v37 }
  0x16   :  { %v123_v16 = vadd.f32 1e-08, %v115_v13  ;;  %v108_v17 = vadd.f32 %v107_v15, %v106_v12  ;;  %v1012_v50 = vunpack.c.l.bf16 %v1064_v38  ;;  %v1013_v51 = vunpack.c.h.bf16 %v1064_v38 }
  0x17   :  { %246 = vperm.xlu2 %1085, %v119_v63   ;;  %965 = vmatmul.msk.bf16.vlgmr.msra.gmra.mxu1 %vm517_vm2, %v991_v8 }
  0x18   :  { %v122_v18 = vadd.f32 1e-08, %v108_v17 }
  0x1b   :  { %236 = vperm.xlu0 %1096, %v117_v3  }
  0x1d   :  { %256 = vperm.xlu1 %1079, %v121_v6  }
  0x1f   :  { %1098 = vperm.xlu2 %1085, %v1097_v10  }
  0x23   :  { %251 = vperm.xlu0 %1096, %v120_v14  }
  0x25   :  { %266 = vperm.xlu1 %1079, %v123_v16  }
  0x27   :  { %966 = vmatmul.msk.bf16.gmra.mxu1 %vm517_vm2, %v992_v21 }
  0x2b   :  { %261 = vperm.xlu0 %1096, %v122_v18  }
  0x37   :  { %967 = vmatmul.msk.bf16.gmra.mxu1 %vm517_vm2, %v993_v41 }
  0x61   :  { %v1088_v11 = vpop.permute.xlu2 %1087 }
  0x62   :  { %v1090_v24 = vunpack.i.h.bf16 %v1088_v11  ;;  %v1089_v28 = vunpack.i.l.bf16 %v1088_v11 }
  0x64   :  { %v167_v26 = vmul.f32 %v1090_v24, %v1005_v25  ;;  %v166_v36 = vmul.f32 %v1089_v28, %v1004_v29 }
  0x66   :  { %v194_v33 = vsel %vm172_vm3, %v167_v26, 0.0  ;;  %v187_v46 = vsel %vm172_vm3, %v166_v36, 0.0 }
  0x67   :  { %v195_v39 = vrot.slane %v194_v33, 4  ;;  %v188_v61 = vrot.slane %v187_v46, 4 }
  0x69   :  { %v1093_v23 = vpop.permute.xlu2 %1092  ;;  %v196_v56 = vadd.f32 %v195_v39, %v194_v33  ;;  %v189_v6 = vadd.f32 %v188_v61, %v187_v46 }
  0x6a   :  { %v1094_v31 = vunpack.i.l.bf16 %v1093_v23  ;;  %v1095_v34 = vunpack.i.h.bf16 %v1093_v23 }
  0x6b   :  { %v197_v2 = vrot.slane %v196_v56, 2  ;;  %v190_v8 = vrot.slane %v189_v6, 2 }
  0x6c   :  { %v168_v40 = vmul.f32 %v1094_v31, %v1008_v32  ;;  %v169_v43 = vmul.f32 %v1095_v34, %v1009_v35  ;;  %v994_v31 = vld [vmem:[%s1516_s0 + $0x30] sm:$0xff] }
  0x6d   :  { %v198_v15 = vadd.f32 %v197_v2, %v196_v56  ;;  %v191_v34 = vadd.f32 %v190_v8, %v189_v6  ;;  %968 = vmatmul.msk.bf16.gmra.mxu1 %vm517_vm2, %v994_v31 }
  0x6e   :  { %v201_v57 = vsel %vm172_vm3, %v168_v40, 0.0  ;;  %v208_v58 = vsel %vm172_vm3, %v169_v43, 0.0 }
  0x6f   :  { %v202_v1 = vrot.slane %v201_v57, 4  ;;  %v209_v3 = vrot.slane %v208_v58, 4  ;;  %v199_v27 = vrot.slane %v198_v15, 1  ;;  %v192_v46 = vrot.slane %v191_v34, 1 }
  0x71   :  { %v1207_v30 = vpop.permute.xlu2 %246  ;;  %v203_v12 = vadd.f32 %v202_v1, %v201_v57  ;;  %v210_v16 = vadd.f32 %v209_v3, %v208_v58  ;;  %v200_v39 = vadd.f32 %v199_v27, %v198_v15 }
  0x72   :  { %1102 = vrcp.f32 %v1207_v30  ;;  %vm319_vm4 = vweird.f32 %v1207_v30  ;;  %v325_v17 = vand.u32 2147483648, %v1207_v30  ;;  %v323_v21 = vand.u32 2147483647, %v1207_v30 }
  0x73   :  { %v204_v23 = vrot.slane %v203_v12, 2  ;;  %v211_v28 = vrot.slane %v210_v16, 2 }
  0x74   :  { %vm324_vm7 = vcmp.eq.f32.partialorder %v323_v21, 8.507059e+37 }
  0x75   :  { %v205_v36 = vadd.f32 %v204_v23, %v203_v12  ;;  %v212_v40 = vadd.f32 %v211_v28, %v210_v16  ;;  %v995_v16 = vld [vmem:[%s1516_s0 + $0x38] sm:$0xff] }
  0x78   :  { %v1220_v42 = vpop.eup %1102  ;;  %v1082_v48 = vpop.permute.xlu1 %1081 }
  0x79   :  { %v315_v47 = vmul.f32 %v1220_v42, %v1207_v30  ;;  %v1099_v49 = vpop.permute.xlu2 %1098  ;;  %v1084_v52 = vunpack.i.h.bf16 %v1082_v48  ;;  %v1083_v53 = vunpack.i.l.bf16 %v1082_v48  ;;  %vm320_vm5 = vweird.f32 %v1220_v42 }
  0x7a   :  { %v1101_v54 = vunpack.i.h.bf16 %v1099_v49  ;;  %v1100_v55 = vunpack.i.l.bf16 %v1099_v49  ;;  %vm1240_vm6 = vmor %vm319_vm4, %vm320_vm5  ;;  %v326_v30 = vor.u32 1.1754944e-38, %v325_v17  ;;  %v206_v49 = vrot.slane %v205_v36, 1 }
  0x7b   :  { %v164_v59 = vmul.f32 %v1083_v53, %v1000_v44  ;;  %v165_v60 = vmul.f32 %v1084_v52, %v1001_v45  ;;  %v316_v62 = vsub.f32 1.0, %v315_v47  ;;  %v987_v52 = vld [vmem:[%s1518_s5 + $0x8] sm:$0xff]  ;;  %v213_v53 = vrot.slane %v212_v40, 1 }
  0x7c   :  { %v170_v63 = vmul.f32 %v1100_v55, %v1012_v50  ;;  %v171_v0 = vmul.f32 %v1101_v54, %v1013_v51  ;;  %453 = vmatpush.bf16.msra.mxu0 %v987_v52 }
  0x7d   :  { %v173_v4 = vsel %vm172_vm3, %v164_v59, 0.0  ;;  %v180_v5 = vsel %vm172_vm3, %v165_v60, 0.0  ;;  %v317_v7 = vmul.f32 %v1220_v42, %v316_v62  ;;  %v986_v60 = vld [vmem:[%s1518_s5] sm:$0xff]  ;;  %v1284_v3 = vadd.f32 %v213_v53, %v212_v40  ;;  %969 = vmatmul.msk.bf16.gmra.mxu1 %vm517_vm2, %v995_v16 }
  0x7e   :  { %v215_v9 = vsel %vm172_vm3, %v170_v63, 0.0  ;;  %v222_v10 = vsel %vm172_vm3, %v171_v0, 0.0  ;;  %v174_v13 = vrot.slane %v173_v4, 4  ;;  %v181_v14 = vrot.slane %v180_v5, 4 }
  0x7f   :  { %v216_v18 = vrot.slane %v215_v9, 4  ;;  %v223_v19 = vrot.slane %v222_v10, 4  ;;  %v318_v11 = vadd.f32 %v1220_v42, %v317_v7  ;;  %v1280_v63 = vadd.f32 %v192_v46, %v191_v34 }
  0x80   :  { %v175_v25 = vadd.f32 %v174_v13, %v173_v4  ;;  %v182_v26 = vadd.f32 %v181_v14, %v180_v5  ;;  %v1282_v0 = vadd.f32 %v206_v49, %v205_v36  ;;  %454 = vmatpush.bf16.msra.mxu0 %v986_v60 }
  0x81   :  { %v217_v32 = vadd.f32 %v216_v18, %v215_v9  ;;  %v224_v33 = vadd.f32 %v223_v19, %v222_v10  ;;  %v322_v35 = vsel %vm1240_vm6, %v1220_v42, %v318_v11 }
  0x82   :  { %v176_v37 = vrot.slane %v175_v25, 2  ;;  %v183_v38 = vrot.slane %v182_v26, 2  ;;  %v327_v43 = vsel %vm324_vm7, %v326_v30, %v322_v35 }
  0x83   :  { %v218_v44 = vrot.slane %v217_v32, 2  ;;  %v225_v45 = vrot.slane %v224_v33, 2  ;;  %v1267_v54 = vmul.f32 %v327_v43, %v200_v39 }
  0x84   :  { %v177_v50 = vadd.f32 %v176_v37, %v175_v25  ;;  %v184_v51 = vadd.f32 %v183_v38, %v182_v26  ;;  %553 = vmatpush.bf16.msrb.mxu0 %v1190_v20 }
  0x85   :  { %v1238_v22 = vpop.permute.xlu0 %231  ;;  %v1273_v58 = vadd.f32 %v218_v44, %v217_v32  ;;  %v226_v59 = vadd.f32 %v225_v45, %v224_v33  ;;  %v392_v4 = vpack.c.bf16 %v1267_v54, %v1267_v54 }
  0x86   :  { %1104 = vrcp.f32 %v1238_v22  ;;  %v178_v1 = vrot.slane %v177_v50, 1  ;;  %v185_v2 = vrot.slane %v184_v51, 1  ;;  %vm274_vm8 = vweird.f32 %v1238_v22 }
  0x87   :  { %v1245_v29 = vpop.permute.xlu1 %241  ;;  %v220_v7 = vrot.slane %v1273_v58, 1  ;;  %v227_v9 = vrot.slane %v226_v59, 1  ;;  %v278_v12 = vand.u32 2147483647, %v1238_v22  ;;  %v280_v8 = vand.u32 2147483648, %v1238_v22 }
  0x88   :  { %1106 = vrcp.f32 %v1245_v29  ;;  %v308_v10 = vand.u32 2147483647, %v1245_v29  ;;  %vm304_vm9 = vweird.f32 %v1245_v29  ;;  %v179_v18 = vadd.f32 %v178_v1, %v177_v50 }
  0x89   :  { %v186_v19 = vadd.f32 %v185_v2, %v184_v51  ;;  %v310_v21 = vand.u32 2147483648, %v1245_v29  ;;  %v1314_v20 = vadd.f32 %v227_v9, %v226_v59  ;;  %v281_v33 = vor.u32 1.1754944e-38, %v280_v8 }
  0x8a   :  { %vm1316_vm12 = vcmp.eq.f32.partialorder %v308_v10, 8.507059e+37  ;;  %vm279_vm1 = vcmp.eq.f32.partialorder %v278_v12, 8.507059e+37 }
  0x8b   :  { %v311_v37 = vor.u32 1.1754944e-38, %v310_v21 }
  0x8c   :  { %v1255_v41 = vpop.eup %1104 }
  0x8d   :  { %v270_v47 = vmul.f32 %v1255_v41, %v1238_v22  ;;  %v1259_v48 = vpop.permute.xlu0 %236  ;;  %vm275_vm10 = vweird.f32 %v1255_v41 }
  0x8e   :  { %v1261_v42 = vpop.eup %1106  ;;  %1108 = vrcp.f32 %v1259_v48  ;;  %vm1324_vm13 = vmor %vm274_vm8, %vm275_vm10  ;;  %v293_v30 = vand.u32 2147483647, %v1259_v48  ;;  %v295_v32 = vand.u32 2147483648, %v1259_v48  ;;  %vm289_vm4 = vweird.f32 %v1259_v48 }
  0x8f   :  { %v300_v55 = vmul.f32 %v1261_v42, %v1245_v29  ;;  %v271_v56 = vsub.f32 1.0, %v270_v47  ;;  %v1271_v57 = vpop.permute.xlu1 %256  ;;  %vm305_vm11 = vweird.f32 %v1261_v42 }
  0x90   :  { %1110 = vrcp.f32 %v1271_v57  ;;  %vm1337_vm14 = vmor %vm304_vm9, %vm305_vm11  ;;  %v353_v34 = vand.u32 2147483647, %v1271_v57  ;;  %v355_v38 = vand.u32 2147483648, %v1271_v57  ;;  %vm349_vm5 = vweird.f32 %v1271_v57 }
  0x91   :  { %v301_v61 = vsub.f32 1.0, %v300_v55  ;;  %v272_v62 = vmul.f32 %v1255_v41, %v271_v56  ;;  %vm294_vm7 = vcmp.eq.f32.partialorder %v293_v30, 8.507059e+37  ;;  %v296_v43 = vor.u32 1.1754944e-38, %v295_v32 }
  0x92   :  { %vm1354_vm8 = vcmp.eq.f32.partialorder %v353_v34, 8.507059e+37  ;;  %v356_v50 = vor.u32 1.1754944e-38, %v355_v38  ;;  %vm417_vm9 = vcmask 1041409  }
  0x93   :  { %v302_v5 = vmul.f32 %v1261_v42, %v301_v61  ;;  %v273_v13 = vadd.f32 %v1255_v41, %v272_v62 }
  0x94   :  { %v1109_v6 = vpop.eup %1108 }
  0x95   :  { %v285_v14 = vmul.f32 %v1109_v6, %v1259_v48  ;;  %v1297_v15 = vpop.permute.xlu0 %251  ;;  %v303_v11 = vadd.f32 %v1261_v42, %v302_v5  ;;  %v277_v28 = vsel %vm1324_vm13, %v1255_v41, %v273_v13  ;;  %vm290_vm15 = vweird.f32 %v1109_v6 }
  0x96   :  { %v1303_v17 = vpop.eup %1110  ;;  %1112 = vrcp.f32 %v1297_v15  ;;  %v282_v40 = vsel %vm279_vm1, %v281_v33, %v277_v28  ;;  %vm291_vm6 = vmor %vm289_vm4, %vm290_vm15  ;;  %v338_v61 = vand.u32 2147483647, %v1297_v15  ;;  %v340_v62 = vand.u32 2147483648, %v1297_v15 }
  0x97   :  { %v345_v23 = vmul.f32 %v1303_v17, %v1271_v57  ;;  %v1312_v24 = vpop.permute.xlu1 %266  ;;  %v286_v27 = vsub.f32 1.0, %v285_v14  ;;  %v307_v36 = vsel %vm1337_vm14, %v1261_v42, %v303_v11  ;;  %v283_v48 = vmul.f32 %v282_v40, %v179_v18 }
  0x98   :  { %1114 = vrcp.f32 %v1312_v24  ;;  %v312_v47 = vsel %vm1316_vm12, %v311_v37, %v307_v36  ;;  %vm350_vm10 = vweird.f32 %v1303_v17  ;;  %v385_v2 = vand.u32 2147483648, %v1312_v24 }
  0x99   :  { %v346_v31 = vsub.f32 1.0, %v345_v23  ;;  %v287_v35 = vmul.f32 %v1109_v6, %v286_v27  ;;  %v313_v59 = vmul.f32 %v312_v47, %v1280_v63  ;;  %vm1368_vm12 = vmor %vm349_vm5, %vm350_vm10  ;;  %vm379_vm13 = vweird.f32 %v1312_v24 }
  0x9a   :  { %vm334_vm15 = vweird.f32 %v1297_v15  ;;  %v389_v10 = vpack.c.bf16 %v283_v48, %v283_v48  ;;  %v383_v13 = vand.u32 2147483647, %v1312_v24  ;;  %vm339_vm4 = vcmp.eq.f32.partialorder %v338_v61, 8.507059e+37  ;;  %v988_v48 = vld [vmem:[%s1516_s0] sm:$0xff] }
  0x9b   :  { %v347_v29 = vmul.f32 %v1303_v17, %v346_v31  ;;  %v288_v41 = vadd.f32 %v1109_v6, %v287_v35  ;;  %v341_v16 = vor.u32 1.1754944e-38, %v340_v62  ;;  %v412_v40 = vunpack.c.l.b16 %v392_v4 }
  0x9c   :  { %v1113_v39 = vpop.eup %1112  ;;  %v409_v26 = vunpack.c.l.b16 %v389_v10 }
  0x9d   :  { %v330_v44 = vmul.f32 %v1113_v39, %v1297_v15  ;;  %v1350_v45 = vpop.permute.xlu0 %261  ;;  %v292_v49 = vsel %vm291_vm6, %v1109_v6, %v288_v41  ;;  %v348_v53 = vadd.f32 %v1303_v17, %v347_v29  ;;  %vm335_vm11 = vweird.f32 %v1113_v39 }
  0x9e   :  { %v1115_v46 = vpop.eup %1114  ;;  %1116 = vrcp.f32 %v1350_v45  ;;  %v297_v51 = vsel %vm294_vm7, %v296_v43, %v292_v49  ;;  %vm336_vm1 = vmor %vm334_vm15, %vm335_vm11  ;;  %v386_v15 = vor.u32 1.1754944e-38, %v385_v2  ;;  %vm384_vm6 = vcmp.eq.f32.partialorder %v383_v13, 8.507059e+37 }
  0x9f   :  { %v375_v52 = vmul.f32 %v1115_v46, %v1312_v24  ;;  %v298_v55 = vmul.f32 %v297_v51, %v186_v19  ;;  %v331_v56 = vsub.f32 1.0, %v330_v44  ;;  %vm380_vm14 = vweird.f32 %v1115_v46  ;;  %v990_v51 = vld [vmem:[%s1516_s0 + $0x10] sm:$0xff] }
  0xa0   :  { %v352_v12 = vsel %vm1368_vm12, %v1303_v17, %v348_v53  ;;  %v391_v19 = vpack.c.bf16 %v313_v59, %v313_v59  ;;  %vm381_vm5 = vmor %vm379_vm13, %vm380_vm14  ;;  %v370_v28 = vand.u32 2147483648, %v1350_v45  ;;  %v368_v30 = vand.u32 2147483647, %v1350_v45  ;;  %v997_v59 = vld [vmem:[%s1519_s6 + $0x8] sm:$0xff] }
  0xa1   :  { %v376_v60 = vsub.f32 1.0, %v375_v52  ;;  %v390_v1 = vpack.c.bf16 %v298_v55, %v298_v55  ;;  %v332_v5 = vmul.f32 %v1113_v39, %v331_v56  ;;  %v357_v21 = vsel %vm1354_vm8, %v356_v50, %v352_v12  ;;  %v989_v50 = vld [vmem:[%s1516_s0 + $0x8] sm:$0xff]  ;;  %v1415_v52 = vpop.f32.mrf.mxu1  ;;  %1076 = vmatpush.bf16.msra.mxu3 %v997_v59  ;;  %705 = vmatpush.bf16.msra.mxu2 %v997_v59 }
  0xa2   :  { %v358_v32 = vmul.f32 %v357_v21, %v1284_v3  ;;  %vm419_vm8 = vcmask 1042434   ;;  %v411_v34 = vunpack.c.l.b16 %v391_v19  ;;  %vm364_vm10 = vweird.f32 %v1350_v45 }
  0xa3   :  { %v377_v9 = vmul.f32 %v1115_v46, %v376_v60  ;;  %v333_v14 = vadd.f32 %v1113_v39, %v332_v5  ;;  %v410_v8 = vunpack.c.l.b16 %v390_v1  ;;  %v371_v36 = vor.u32 1.1754944e-38, %v370_v28  ;;  %v996_v60 = vld [vmem:[%s1519_s6] sm:$0xff] }
  0xa4   :  { %v1117_v63 = vpop.eup %1116  ;;  %vm421_vm12 = vcmask 1043459   ;;  %vm369_vm13 = vcmp.eq.f32.partialorder %v368_v30, 8.507059e+37  ;;  %v394_v29 = vpack.c.bf16 %v358_v32, %v358_v32  ;;  %vm423_vm14 = vcmask 1044484  }
  0xa5   :  { %v378_v57 = vadd.f32 %v1115_v46, %v377_v9  ;;  %v360_v18 = vmul.f32 %v1117_v63, %v1350_v45  ;;  %v337_v11 = vsel %vm336_vm1, %v1113_v39, %v333_v14  ;;  %vm365_vm7 = vweird.f32 %v1117_v63  ;;  %1077 = vmatpush.bf16.msra.mxu3 %v996_v60  ;;  %706 = vmatpush.bf16.msra.mxu2 %v996_v60 }
  0xa6   :  { %v342_v23 = vsel %vm339_vm4, %v341_v16, %v337_v11  ;;  %v418_v33 = vsel %vm417_vm9, %v410_v8, %v409_v26  ;;  %vm366_vm11 = vmor %vm364_vm10, %vm365_vm7  ;;  %vm425_vm15 = vcmask 1045509   ;;  %v414_v45 = vunpack.c.l.b16 %v394_v29 }
  0xa7   :  { %v382_v17 = vsel %vm381_vm5, %v1115_v46, %v378_v57  ;;  %v361_v25 = vsub.f32 1.0, %v360_v18  ;;  %v343_v27 = vmul.f32 %v342_v23, %v1282_v0  ;;  %v221_v0 = vadd.f32 %v220_v7, %v1273_v58 }
  0xa8   :  { %v387_v24 = vsel %vm384_vm6, %v386_v15, %v382_v17  ;;  %v420_v3 = vsel %vm419_vm8, %v411_v34, %v418_v33  ;;  %vm427_vm1 = vcmask 1046534   ;;  %vm429_vm4 = vcmask 1047559  }
  0xa9   :  { %v362_v31 = vmul.f32 %v1117_v63, %v361_v25  ;;  %v393_v22 = vpack.c.bf16 %v343_v27, %v343_v27  ;;  %v388_v37 = vmul.f32 %v387_v24, %v1314_v20  ;;  %v422_v58 = vsel %vm421_vm12, %v412_v40, %v420_v3  ;;  %v1417_v53 = vpop.f32.mrf.mxu1 }
  0xab   :  { %v363_v35 = vadd.f32 %v1117_v63, %v362_v31  ;;  %v413_v38 = vunpack.c.l.b16 %v393_v22  ;;  %v396_v44 = vpack.c.bf16 %v388_v37, %v388_v37 }
  0xad   :  { %v367_v39 = vsel %vm366_vm11, %v1117_v63, %v363_v35  ;;  %v424_v20 = vsel %vm423_vm14, %v413_v38, %v422_v58  ;;  %v416_v47 = vunpack.c.l.b16 %v396_v44 }
  0xae   :  { %v372_v41 = vsel %vm369_vm13, %v371_v36, %v367_v39  ;;  %v426_v42 = vsel %vm425_vm15, %v414_v45, %v424_v20 }
  0xaf   :  { %v373_v43 = vmul.f32 %v372_v41, %v221_v0 }
  0xb1   :  { %v395_v7 = vpack.c.bf16 %v373_v43, %v373_v43  ;;  %v1419_v55 = vpop.f32.mrf.mxu1 }
  0xb3   :  { %v415_v46 = vunpack.c.l.b16 %v395_v7 }
  0xb5   :  { %v428_v54 = vsel %vm427_vm1, %v415_v46, %v426_v42 }
  0xb6   :  { %v430_v4 = vsel %vm429_vm4, %v416_v47, %v428_v54 }
  0xb7   :  { %v431_v49 = vpack.c.b16 %v430_v4, %v430_v4 }
  0xb9   :  { %929 = vmatmul.msk.bf16.vlgmr.msra.gmra.mxu0 %vm172_vm3, %v431_v49  ;;  %v1421_v56 = vpop.f32.mrf.mxu1 }
  0xc1   :  { %v580_v61 = vpop.f32.mrf.mxu1 }
  0xc9   :  { %962 = vmatmul.msk.bf16.vlgmr.msrb.gmra.mxu0 %vm517_vm2, %v988_v48  ;;  %v582_v62 = vpop.f32.mrf.mxu1 }
  0xd9   :  { %963 = vmatmul.msk.bf16.gmra.mxu0 %vm517_vm2, %v989_v50 }
  0xe9   :  { %964 = vmatmul.msk.bf16.gmra.mxu0 %vm517_vm2, %v990_v51 }
  0xea   :  { %v585_v1 = vpop.f32.mrf.mxu1 }
  0xf2   :  { %v587_v16 = vpop.f32.mrf.mxu1 }
  0xfa   :  { %v590_v11 = vpop.f32.mrf.mxu1 }
 0x102   :  { %v592_v33 = vpop.f32.mrf.mxu1 }
 0x136   :  { %v1429_v2 = vpop.f32.mrf.mxu0 }
 0x137   :  { %v600_v5 = vrot.slane %v1429_v2, 5  ;;  %v601_v57 = vrot.slane %v1429_v2, 6  ;;  %v603_v21 = vperm.slane %v1429_v2, 0  ;;  %v602_v27 = vrot.slane %v1429_v2, 7 }
 0x138   :  { %v596_v36 = vrot.slane %v1429_v2, 1  ;;  %v597_v20 = vrot.slane %v1429_v2, 2  ;;  %v598_v48 = vrot.slane %v1429_v2, 3 }
 0x139   :  { %v608_v6 = vperm.slane %v600_v5, 0  ;;  %v609_v18 = vperm.slane %v601_v57, 0  ;;  %v610_v32 = vperm.slane %v602_v27, 0 }
 0x13a   :  { %v604_v39 = vperm.slane %v596_v36, 0  ;;  %v605_v45 = vperm.slane %v597_v20, 0  ;;  %v606_v50 = vperm.slane %v598_v48, 0 }
 0x13b   :  { %v629_v9 = vadd.f32 %v608_v6, %v580_v61  ;;  %v630_v63 = vadd.f32 %v608_v6, %v582_v62  ;;  %v631_v8 = vadd.f32 %v609_v18, %v585_v1  ;;  %v632_v15 = vadd.f32 %v609_v18, %v587_v16 }
 0x13c   :  { %v633_v35 = vadd.f32 %v610_v32, %v590_v11  ;;  %v634_v0 = vadd.f32 %v610_v32, %v592_v33  ;;  %v625_v51 = vadd.f32 %v606_v50, %v1415_v52  ;;  %v626_v59 = vadd.f32 %v606_v50, %v1417_v53  ;;  %v1072_v52 = vld [vmem:[%s1520_s3 + $0x28] sm:$0xff]   ;;  %v1031_v11 = vld [vmem:[%s1520_s3] sm:$0xff]  }
 0x13d   :  { %v645_v10 = vmax.f32 %v629_v9, 0.0  ;;  %v646_v12 = vmax.f32 %v630_v63, 0.0  ;;  %v647_v17 = vmax.f32 %v631_v8, 0.0  ;;  %v648_v23 = vmax.f32 %v632_v15, 0.0  ;;  %v1068_v33 = vld [vmem:[%s1520_s3 + $0x8] sm:$0xff]  }
 0x13e   :  { %v458_v13 = vpop.f32.mrf.mxu0  ;;  %v649_v37 = vmax.f32 %v633_v35, 0.0  ;;  %v650_v38 = vmax.f32 %v634_v0, 0.0  ;;  %v641_v60 = vmax.f32 %v625_v51, 0.0  ;;  %v642_v61 = vmax.f32 %v626_v59, 0.0 }
 0x13f   :  { %v656_v14 = vpack.c.bf16 %v646_v12, %v645_v10  ;;  %v657_v31 = vpack.c.bf16 %v648_v23, %v647_v17  ;;  %v599_v1 = vrot.slane %v1429_v2, 4  ;;  %v1052_v53 = vunpack.c.l.bf16 %v1072_v52 }
 0x140   :  { %v658_v29 = vpack.c.bf16 %v650_v38, %v649_v37  ;;  %v654_v62 = vpack.c.bf16 %v642_v61, %v641_v60  ;;  %v1053_v16 = vunpack.c.h.bf16 %v1072_v52  ;;  %v1032_v23 = vunpack.c.l.bf16 %v1031_v11 }
 0x141   :  { %983 = vmatmul.msk.bf16.vlgmr.msra.gmra.mxu3 %vm172_vm3, %v656_v14  ;;  %v607_v5 = vperm.slane %v599_v1, 0  ;;  %v1036_v0 = vunpack.c.l.bf16 %v1068_v33 }
 0x143   :  { %v627_v6 = vadd.f32 %v607_v5, %v1419_v55  ;;  %v628_v9 = vadd.f32 %v607_v5, %v1421_v56  ;;  %v1458_v56 = vld [vmem:[%s1520_s3 + $0x30] sm:$0xff]  }
 0x144   :  { %v1056_v15 = vunpack.c.l.bf16 %v1458_v56 }
 0x145   :  { %v643_v63 = vmax.f32 %v627_v6, 0.0  ;;  %v644_v10 = vmax.f32 %v628_v9, 0.0  ;;  %v1057_v6 = vunpack.c.h.bf16 %v1458_v56 }
 0x146   :  { %v555_v19 = vpop.f32.mrf.mxu0 }
 0x147   :  { %v619_v25 = vadd.f32 %v603_v21, %v555_v19  ;;  %v655_v12 = vpack.c.bf16 %v644_v10, %v643_v63  ;;  %v1071_v63 = vld [vmem:[%s1520_s3 + $0x20] sm:$0xff]  }
 0x149   :  { %v635_v30 = vmax.f32 %v619_v25, 0.0 }
 0x14e   :  { %v557_v26 = vpop.f32.mrf.mxu0 }
 0x14f   :  { %v620_v28 = vadd.f32 %v603_v21, %v557_v26 }
 0x151   :  { %v636_v24 = vmax.f32 %v620_v28, 0.0  ;;  %984 = vmatmul.msk.bf16.gmra.mxu3 %vm172_vm3, %v657_v31 }
 0x153   :  { %v651_v22 = vpack.c.bf16 %v636_v24, %v635_v30  ;;  %v1033_v24 = vunpack.c.h.bf16 %v1031_v11 }
 0x155   :  { %978 = vmatmul.msk.bf16.vlgmr.msra.gmra.mxu2 %vm172_vm3, %v651_v22 }
 0x156   :  { %v560_v34 = vpop.f32.mrf.mxu0 }
 0x157   :  { %v621_v3 = vadd.f32 %v604_v39, %v560_v34 }
 0x159   :  { %v637_v43 = vmax.f32 %v621_v3, 0.0  ;;  %v1037_v3 = vunpack.c.h.bf16 %v1068_v33 }
 0x15e   :  { %v562_v40 = vpop.f32.mrf.mxu0 }
 0x15f   :  { %v622_v41 = vadd.f32 %v604_v39, %v562_v40 }
 0x161   :  { %v638_v44 = vmax.f32 %v622_v41, 0.0  ;;  %985 = vmatmul.msk.bf16.gmra.mxu3 %vm172_vm3, %v658_v29  ;;  %v1069_v41 = vld [vmem:[%s1520_s3 + $0x10] sm:$0xff]  }
 0x163   :  { %v652_v58 = vpack.c.bf16 %v638_v44, %v637_v43 }
 0x165   :  { %979 = vmatmul.msk.bf16.gmra.mxu2 %vm172_vm3, %v652_v58  ;;  %v1040_v58 = vunpack.c.l.bf16 %v1069_v41 }
 0x166   :  { %v565_v7 = vpop.f32.mrf.mxu0 }
 0x167   :  { %v623_v46 = vadd.f32 %v605_v45, %v565_v7 }
 0x169   :  { %v639_v54 = vmax.f32 %v623_v46, 0.0 }
 0x16e   :  { %v567_v47 = vpop.f32.mrf.mxu0 }
 0x16f   :  { %v624_v42 = vadd.f32 %v605_v45, %v567_v47  ;;  %v1041_v47 = vunpack.c.h.bf16 %v1069_v41 }
 0x171   :  { %v640_v4 = vmax.f32 %v624_v42, 0.0 }
 0x173   :  { %v653_v49 = vpack.c.bf16 %v640_v4, %v639_v54  ;;  %v1070_v4 = vld [vmem:[%s1520_s3 + $0x18] sm:$0xff]  }
 0x174   :  { %v1044_v50 = vunpack.c.l.bf16 %v1070_v4 }
 0x175   :  { %980 = vmatmul.msk.bf16.gmra.mxu2 %vm172_vm3, %v653_v49 }
 0x185   :  { %981 = vmatmul.msk.bf16.gmra.mxu2 %vm172_vm3, %v654_v62  ;;  %v1045_v62 = vunpack.c.h.bf16 %v1070_v4 }
 0x195   :  { %982 = vmatmul.msk.bf16.gmra.mxu2 %vm172_vm3, %v655_v12  ;;  %vm912_vm3 = vcmask 130048  }
 0x1c4   :  { %v733_v13 = vpop.f32.mrf.mxu3 }
 0x1c5   :  { %v790_v14 = vsub.f32 %v733_v13, %v1052_v53  ;;  %v1048_v53 = vunpack.c.l.bf16 %v1071_v63  ;;  %v1074_v13 = vld [vmem:[%s1520_s3 + $0x38] sm:$0xff]  }
 0x1c7   :  { %v806_v2 = vmul.f32 %v790_v14, %v790_v14 }
 0x1c9   :  { %v842_v57 = vsel %vm517_vm2, %v806_v2, 0.0 }
 0x1ca   :  { %843 = vadd.xlane.f32.xlu0 %v842_v57 }
 0x1cc   :  { %v735_v55 = vpop.f32.mrf.mxu3 }
 0x1cd   :  { %v791_v18 = vsub.f32 %v735_v55, %v1053_v16  ;;  %v1060_v16 = vunpack.c.l.bf16 %v1074_v13 }
 0x1cf   :  { %v807_v19 = vmul.f32 %v791_v18, %v791_v18 }
 0x1d1   :  { %v845_v8 = vsel %vm517_vm2, %v807_v19, 0.0 }
 0x1d2   :  { %846 = vadd.xlane.f32.xlu1 %v845_v8 }
 0x1d4   :  { %v738_v21 = vpop.f32.mrf.mxu3 }
 0x1d5   :  { %v792_v17 = vsub.f32 %v738_v21, %v1056_v15  ;;  %v1049_v15 = vunpack.c.h.bf16 %v1071_v63 }
 0x1d7   :  { %v808_v25 = vmul.f32 %v792_v17, %v792_v17  ;;  %v1061_v17 = vunpack.c.h.bf16 %v1074_v13 }
 0x1d8   :  { %v708_v26 = vpop.f32.mrf.mxu2 }
 0x1d9   :  { %v780_v27 = vsub.f32 %v708_v26, %v1032_v23  ;;  %v848_v28 = vsel %vm517_vm2, %v808_v25, 0.0 }
 0x1da   :  { %849 = vadd.xlane.f32.xlu2 %v848_v28 }
 0x1db   :  { %v796_v31 = vmul.f32 %v780_v27, %v780_v27 }
 0x1dc   :  { %v740_v1 = vpop.f32.mrf.mxu3 }
 0x1dd   :  { %v812_v30 = vsel %vm517_vm2, %v796_v31, 0.0  ;;  %v793_v12 = vsub.f32 %v740_v1, %v1057_v6 }
 0x1de   :  { %813 = vadd.xlane.f32.xlu0 %v812_v30 }
 0x1df   :  { %v809_v57 = vmul.f32 %v793_v12, %v793_v12 }
 0x1e0   :  { %v710_v32 = vpop.f32.mrf.mxu2 }
 0x1e1   :  { %v781_v22 = vsub.f32 %v710_v32, %v1033_v24  ;;  %v851_v19 = vsel %vm517_vm2, %v809_v57, 0.0 }
 0x1e3   :  { %v797_v34 = vmul.f32 %v781_v22, %v781_v22 }
 0x1e4   :  { %v743_v14 = vpop.f32.mrf.mxu3 }
 0x1e5   :  { %v815_v35 = vsel %vm517_vm2, %v797_v34, 0.0  ;;  %v794_v56 = vsub.f32 %v743_v14, %v1060_v16 }
 0x1e6   :  { %816 = vadd.xlane.f32.xlu1 %v815_v35 }
 0x1e7   :  { %v810_v21 = vmul.f32 %v794_v56, %v794_v56 }
 0x1e8   :  { %v713_v36 = vpop.f32.mrf.mxu2 }
 0x1e9   :  { %v782_v37 = vsub.f32 %v713_v36, %v1036_v0  ;;  %v854_v28 = vsel %vm517_vm2, %v810_v21, 0.0 }
 0x1eb   :  { %v798_v38 = vmul.f32 %v782_v37, %v782_v37 }
 0x1ec   :  { %v745_v25 = vpop.f32.mrf.mxu3 }
 0x1ed   :  { %v818_v39 = vsel %vm517_vm2, %v798_v38, 0.0  ;;  %v795_v27 = vsub.f32 %v745_v25, %v1061_v17  ;;  %v876_v38 = vlaneseq }
 0x1ee   :  { %819 = vadd.xlane.f32.xlu2 %v818_v39 }
 0x1ef   :  { %v811_v30 = vmul.f32 %v795_v27, %v795_v27 }
 0x1f0   :  { %v715_v40 = vpop.f32.mrf.mxu2 }
 0x1f1   :  { %v783_v29 = vsub.f32 %v715_v40, %v1037_v3  ;;  %v857_v24 = vsel %vm517_vm2, %v811_v30, 0.0  ;;  %v877_v3 = vand.u32 127, %v876_v38 }
 0x1f3   :  { %v799_v43 = vmul.f32 %v783_v29, %v783_v29  ;;  %v879_v29 = vadd.s32 4294967288, %v877_v3 }
 0x1f5   :  { %v821_v44 = vsel %vm517_vm2, %v799_v43, 0.0 }
 0x1f6   :  { %822 = vadd.xlane.f32.xlu2 %v821_v44 }
 0x1f8   :  { %v718_v7 = vpop.f32.mrf.mxu2 }
 0x1f9   :  { %v784_v20 = vsub.f32 %v718_v7, %v1040_v58 }
 0x1fb   :  { %v800_v45 = vmul.f32 %v784_v20, %v784_v20 }
 0x1fd   :  { %v824_v46 = vsel %vm517_vm2, %v800_v45, 0.0 }
 0x1fe   :  { %825 = vadd.xlane.f32.xlu0 %v824_v46 }
 0x200   :  { %v720_v42 = vpop.f32.mrf.mxu2 }
 0x201   :  { %v785_v54 = vsub.f32 %v720_v42, %v1041_v47 }
 0x203   :  { %v801_v49 = vmul.f32 %v785_v54, %v785_v54 }
 0x205   :  { %v827_v48 = vsel %vm517_vm2, %v801_v49, 0.0 }
 0x206   :  { %828 = vadd.xlane.f32.xlu1 %v827_v48 }
 0x208   :  { %v723_v51 = vpop.f32.mrf.mxu2 }
 0x209   :  { %v786_v59 = vsub.f32 %v723_v51, %v1044_v50 }
 0x20b   :  { %v802_v60 = vmul.f32 %v786_v59, %v786_v59 }
 0x20d   :  { %v830_v61 = vsel %vm517_vm2, %v802_v60, 0.0 }
 0x20e   :  { %831 = vadd.xlane.f32.xlu2 %v830_v61 }
 0x210   :  { %v725_v5 = vpop.f32.mrf.mxu2 }
 0x211   :  { %v787_v9 = vsub.f32 %v725_v5, %v1045_v62 }
 0x213   :  { %v803_v10 = vmul.f32 %v787_v9, %v787_v9 }
 0x215   :  { %v833_v52 = vsel %vm517_vm2, %v803_v10, 0.0 }
 0x216   :  { %834 = vadd.xlane.f32.xlu0 %v833_v52 }
 0x218   :  { %v728_v2 = vpop.f32.mrf.mxu2 }
 0x219   :  { %v788_v55 = vsub.f32 %v728_v2, %v1048_v53 }
 0x21b   :  { %v804_v18 = vmul.f32 %v788_v55, %v788_v55 }
 0x21d   :  { %v836_v8 = vsel %vm517_vm2, %v804_v18, 0.0 }
 0x21e   :  { %852 = vadd.xlane.f32.xlu0 %v851_v19  ;;  %837 = vadd.xlane.f32.xlu1 %v836_v8 }
 0x220   :  { %v730_v11 = vpop.f32.mrf.mxu2 }
 0x221   :  { %v789_v23 = vsub.f32 %v730_v11, %v1049_v15 }
 0x223   :  { %v805_v26 = vmul.f32 %v789_v23, %v789_v23 }
 0x225   :  { %v839_v31 = vsel %vm517_vm2, %v805_v26, 0.0  ;;  %vm881_vm2 = vcmask 130112  }
 0x226   :  { %855 = vadd.xlane.f32.xlu1 %v854_v28  ;;  %840 = vadd.xlane.f32.xlu2 %v839_v31 }
 0x22e   :  { %858 = vadd.xlane.f32.xlu2 %v857_v24 }
 0x23d   :  { %v844_v22 = vpop.xlane.xlu0 %843 }
 0x23e   :  { %v895_v9 = vperm.slane %v844_v22, %v877_v3 }
 0x245   :  { %v847_v33 = vpop.xlane.xlu1 %846 }
 0x246   :  { %v896_v61 = vperm.slane %v847_v33, %v879_v29 }
 0x248   :  { %v897_v52 = vsel %vm881_vm2, %v896_v61, %v895_v9 }
 0x24d   :  { %v850_v32 = vpop.xlane.xlu2 %849 }
 0x24e   :  { %v898_v53 = vperm.slane %v850_v32, %v877_v3 }
 0x251   :  { %v814_v35 = vpop.xlane.xlu0 %813 }
 0x252   :  { %v878_v47 = vperm.slane %v814_v35, %v877_v3 }
 0x259   :  { %v817_v0 = vpop.xlane.xlu1 %816 }
 0x25a   :  { %v880_v7 = vperm.slane %v817_v0, %v879_v29 }
 0x25c   :  { %v882_v48 = vsel %vm881_vm2, %v880_v7, %v878_v47 }
 0x261   :  { %v820_v34 = vpop.xlane.xlu2 %819 }
 0x262   :  { %v883_v20 = vperm.slane %v820_v34, %v877_v3 }
 0x269   :  { %v823_v36 = vpop.xlane.xlu2 %822 }
 0x26a   :  { %v884_v43 = vperm.slane %v823_v36, %v879_v29 }
 0x26c   :  { %v885_v42 = vsel %vm881_vm2, %v884_v43, %v883_v20 }
 0x26d   :  { %v904_v60 = vsel %vm417_vm9, %v885_v42, %v882_v48 }
 0x271   :  { %v826_v37 = vpop.xlane.xlu0 %825 }
 0x272   :  { %v886_v46 = vperm.slane %v826_v37, %v877_v3 }
 0x279   :  { %v829_v39 = vpop.xlane.xlu1 %828 }
 0x27a   :  { %v887_v44 = vperm.slane %v829_v39, %v879_v29 }
 0x27c   :  { %v888_v4 = vsel %vm881_vm2, %v887_v44, %v886_v46 }
 0x27d   :  { %v905_v62 = vsel %vm419_vm8, %v888_v4, %v904_v60 }
 0x281   :  { %v832_v40 = vpop.xlane.xlu2 %831 }
 0x282   :  { %v889_v54 = vperm.slane %v832_v40, %v877_v3 }
 0x289   :  { %v835_v41 = vpop.xlane.xlu0 %834 }
 0x28a   :  { %v890_v45 = vperm.slane %v835_v41, %v879_v29 }
 0x28c   :  { %v891_v50 = vsel %vm881_vm2, %v890_v45, %v889_v54 }
 0x28d   :  { %v906_v6 = vsel %vm421_vm12, %v891_v50, %v905_v62 }
 0x291   :  { %v838_v58 = vpop.xlane.xlu1 %837  ;;  %v853_v1 = vpop.xlane.xlu0 %852 }
 0x292   :  { %v892_v51 = vperm.slane %v838_v58, %v877_v3  ;;  %v899_v10 = vperm.slane %v853_v1, %v879_v29 }
 0x294   :  { %v900_v16 = vsel %vm881_vm2, %v899_v10, %v898_v53 }
 0x299   :  { %v841_v49 = vpop.xlane.xlu2 %840  ;;  %v856_v12 = vpop.xlane.xlu1 %855 }
 0x29a   :  { %v893_v59 = vperm.slane %v841_v49, %v879_v29  ;;  %v901_v2 = vperm.slane %v856_v12, %v877_v3 }
 0x29c   :  { %v894_v5 = vsel %vm881_vm2, %v893_v59, %v892_v51 }
 0x29d   :  { %v907_v63 = vsel %vm423_vm14, %v894_v5, %v906_v6 }
 0x29e   :  { %v908_v14 = vsel %vm425_vm15, %v897_v52, %v907_v63 }
 0x29f   :  { %v909_v18 = vsel %vm427_vm1, %v900_v16, %v908_v14 }
 0x2a1   :  { %v859_v13 = vpop.xlane.xlu2 %858 }
 0x2a2   :  { %v902_v57 = vperm.slane %v859_v13, %v879_v29 }
 0x2a4   :  { %v903_v55 = vsel %vm881_vm2, %v902_v57, %v901_v2 }
 0x2a5   :  { %v910_v56 = vsel %vm429_vm4, %v903_v55, %v909_v18 }
 0x2a6   :  { %v913_v19 = vsel %vm912_vm3, %v910_v56, 0.0 }
 0x2a7   :  { %914 = vadd.xlane.f32.xlu0 %v913_v19 }
 0x31a   :  { %v915_v8 = vpop.xlane.xlu0 %914 }
 0x31b   :  { %916 = vst.msk [vmem:[%s1521_s7] sm:$0xff] %vm59_vm0, %v915_v8 }

</bundles_post_ra>
